<compile_context>
chip_gen: v7x
topology: tpu7x:2x2x1
jax: 0.10.0
libtpu: 0.0.40
codegen_flags: <defaults>
</compile_context>

<pallas_src>
import functools

import jax
import jax.numpy as jnp
from jax.experimental import pallas as pl
from jax.experimental.pallas import tpu as pltpu


def _round_up(x: int, m: int) -> int:
    return ((x + m - 1) // m) * m


def _nll_loss_kernel(pred_ref, target_ref, out_ref, acc_ref, *,
                     n_total: int, tile_n: int, inv_n: float):
    i = pl.program_id(0)

    @pl.when(i == 0)
    def _init():
        acc_ref[0] = jnp.float32(0.0)

    # Load native dtype, accumulate in f32 (cast is free relative to the DMA).
    pred = pred_ref[...].astype(jnp.float32)          # (tile_n, C)
    tgt = target_ref[...]                             # (tile_n, 1) int32
    tn, c = pred.shape

    # One-hot gather via 2D iota + compare (no dynamic gather on TPU), with
    # padded rows of a partial last tile masked out by global row index.
    col_ids = jax.lax.broadcasted_iota(jnp.int32, (tn, c), 1)
    row_ids = jax.lax.broadcasted_iota(jnp.int32, (tn, c), 0) + i * tile_n
    mask = (col_ids == tgt) & (row_ids < n_total)

    # Single fused full reduction (one XLU trip instead of two).
    acc_ref[0] += jnp.sum(jnp.where(mask, pred, 0.0))

    @pl.when(i == pl.num_programs(0) - 1)
    def _finalize():
        # nll_loss default reduction='mean': -mean(log_prob of true class).
        out_ref[0, 0] = -acc_ref[0] * jnp.float32(inv_n)


def nll_loss_pallas(pred, target, trans_feat=None, *, tile_n: int = 2048):
    """Equivalent of get_loss().forward(pred, target, trans_feat)."""
    del trans_feat  # unused, matching the reference module
    n, c = pred.shape
    target2d = target.astype(jnp.int32).reshape(n, 1)

    # Sublane alignment depends on dtype packing (f32: 8, bf16: 16, int8: 32).
    itemsize = jnp.dtype(pred.dtype).itemsize
    sublane = {4: 8, 2: 16, 1: 32}.get(itemsize, 8)
    tile_n = max(sublane,
                 min(_round_up(tile_n, sublane), _round_up(n, sublane)))
    num_tiles = pl.cdiv(n, tile_n)

    kernel = functools.partial(
        _nll_loss_kernel, n_total=n, tile_n=tile_n, inv_n=1.0 / n)

    out = pl.pallas_call(
        kernel,
        out_shape=jax.ShapeDtypeStruct((1, 1), jnp.float32),
        grid_spec=pltpu.PrefetchScalarGridSpec(
            num_scalar_prefetch=0,
            grid=(num_tiles,),
            in_specs=[
                pl.BlockSpec((tile_n, c), lambda i: (i, 0)),   # pred tile
                pl.BlockSpec((tile_n, 1), lambda i: (i, 0)),   # target tile
            ],
            out_specs=pl.BlockSpec(memory_space=pltpu.MemorySpace.SMEM),
            scratch_shapes=[pltpu.SMEM((1,), jnp.float32)],
        ),
        compiler_params=pltpu.CompilerParams(
            dimension_semantics=("arbitrary",),   # reduction axis
        ),
        cost_estimate=pl.CostEstimate(
            flops=2 * n * c,
            transcendentals=0,
            bytes_accessed=n * c * itemsize + n * 4 + 4,
        ),
    )(pred, target2d)
    return out[0, 0]


if __name__ == "__main__":
    key = jax.random.PRNGKey(0)
    k_logits, k_tgt, k_tf, k_logits2, k_tgt2 = jax.random.split(key, 5)

    # --- Test 1: small f32 case (single tile), PointNet++-style 40 classes ---
    N, C = 8, 40
    logits = jax.random.normal(k_logits, (N, C), dtype=jnp.float32)
    pred = jax.nn.log_softmax(logits, axis=-1)            # log-probabilities
    target = jax.random.randint(k_tgt, (N,), 0, C, dtype=jnp.int32)
    trans_feat = jax.random.normal(k_tf, (N, 64, 16), dtype=jnp.float32)  # unused

    loss = nll_loss_pallas(pred, target, trans_feat)
    loss = jax.block_until_ready(loss)

    ref = -jnp.mean(pred[jnp.arange(N), target])
    assert jnp.allclose(loss, ref, atol=1e-5, rtol=1e-5), (loss, ref)

    # --- Test 2: multi-tile, partial last tile, native bf16 input ----------
    N2, C2, TILE = 200, 40, 64
    logits2 = jax.random.normal(k_logits2, (N2, C2), dtype=jnp.bfloat16)
    pred2 = jax.nn.log_softmax(logits2, axis=-1)          # stays bf16
    target2 = jax.random.randint(k_tgt2, (N2,), 0, C2, dtype=jnp.int32)

    loss2 = nll_loss_pallas(pred2, target2, None, tile_n=TILE)
    loss2 = jax.block_until_ready(loss2)

    ref2 = -jnp.mean(pred2.astype(jnp.float32)[jnp.arange(N2), target2])
    assert jnp.allclose(loss2, ref2, atol=1e-5, rtol=1e-5), (loss2, ref2)

    print("KERNEL_OK")
</pallas_src>

<mosaic_0001>
module attributes {stable_mosaic.version = 11 : i64} {
  func.func @_nll_loss_kernel(%arg0: i32, %arg1: memref<8x40xf32, #tpu.memory_space<vmem>>, %arg2: memref<8x1xi32, #tpu.memory_space<vmem>>, %arg3: memref<1x1xf32, #tpu.memory_space<smem>>, %arg4: memref<1xf32, #tpu.memory_space<smem>>) attributes {dimension_semantics = [#tpu.dimension_semantics<arbitrary>], iteration_bounds = array<i64: 1>, scalar_prefetch = 0 : i64, scratch_operands = 1 : i64, tpu.core_type = #tpu.core_type<tc>, window_params = [{transform_indices = @transform_0, window_bounds = array<i64: 8, 40>}, {transform_indices = @transform_1, window_bounds = array<i64: 8, 1>}, {transform_indices = @transform_2, window_bounds = array<i64: 1, 1>}]} {
    %c0_i32 = arith.constant 0 : i32
    %0 = arith.cmpi eq, %arg0, %c0_i32 : i32
    %1 = arith.extui %0 : i1 to i32
    %c0_i32_0 = arith.constant 0 : i32
    %2 = arith.cmpi ne, %1, %c0_i32_0 : i32
    scf.if %2 {
      %cst_10 = arith.constant 0.000000e+00 : f32
      %c0_11 = arith.constant 0 : index
      %27 = memref.load %arg4[%c0_11] : memref<1xf32, #tpu.memory_space<smem>>
      memref.store %cst_10, %arg4[%c0_11] : memref<1xf32, #tpu.memory_space<smem>>
    } else {
    }
    %c0 = arith.constant 0 : index
    %c0_1 = arith.constant 0 : index
    %3 = vector.load %arg1[%c0, %c0_1] : memref<8x40xf32, #tpu.memory_space<vmem>>, vector<8x40xf32>
    %c0_2 = arith.constant 0 : index
    %c0_3 = arith.constant 0 : index
    %4 = vector.load %arg2[%c0_2, %c0_3] : memref<8x1xi32, #tpu.memory_space<vmem>>, vector<8x1xi32>
    %5 = tpu.iota {dimensions = array<i32: 1>} : vector<8x40xi32>
    %6 = tpu.iota {dimensions = array<i32: 0>} : vector<8x40xi32>
    %c8_i32 = arith.constant 8 : i32
    %7 = arith.muli %arg0, %c8_i32 : i32
    %8 = vector.broadcast %7 : i32 to vector<8x40xi32>
    %9 = arith.addi %6, %8 : vector<8x40xi32>
    %10 = vector.broadcast %4 : vector<8x1xi32> to vector<8x40xi32>
    %11 = arith.cmpi eq, %5, %10 : vector<8x40xi32>
    %c8_i32_4 = arith.constant 8 : i32
    %12 = vector.broadcast %c8_i32_4 : i32 to vector<8x40xi32>
    %13 = arith.cmpi slt, %9, %12 : vector<8x40xi32>
    %14 = arith.andi %11, %13 : vector<8x40xi1>
    %c0_5 = arith.constant 0 : index
    %15 = memref.load %arg4[%c0_5] : memref<1xf32, #tpu.memory_space<smem>>
    %cst = arith.constant 0.000000e+00 : f32
    %16 = vector.broadcast %cst : f32 to vector<8x40xf32>
    %17 = arith.select %14, %3, %16 : vector<8x40xi1>, vector<8x40xf32>
    %18 = vector.shape_cast %17 : vector<8x40xf32> to vector<1x8x40xf32>
    %cst_6 = arith.constant dense<0.000000e+00> : vector<1xf32>
    %19 = vector.multi_reduction <add>, %18, %cst_6 [1, 2] : vector<1x8x40xf32> to vector<1xf32>
    %20 = vector.shape_cast %19 : vector<1xf32> to vector<1x1x1xf32>
    %21 = vector.extract %20[0, 0, 0] : f32 from vector<1x1x1xf32>
    %22 = arith.addf %15, %21 : f32
    %c0_7 = arith.constant 0 : index
    %23 = memref.load %arg4[%c0_7] : memref<1xf32, #tpu.memory_space<smem>>
    memref.store %22, %arg4[%c0_7] : memref<1xf32, #tpu.memory_space<smem>>
    %c0_i32_8 = arith.constant 0 : i32
    %24 = arith.cmpi eq, %arg0, %c0_i32_8 : i32
    %25 = arith.extui %24 : i1 to i32
    %c0_i32_9 = arith.constant 0 : i32
    %26 = arith.cmpi ne, %25, %c0_i32_9 : i32
    scf.if %26 {
      %c0_10 = arith.constant 0 : index
      %27 = memref.load %arg4[%c0_10] : memref<1xf32, #tpu.memory_space<smem>>
      %cst_11 = arith.constant 0.000000e+00 : f32
      %28 = arith.subf %cst_11, %27 : f32
      %cst_12 = arith.constant 1.250000e-01 : f32
      %29 = arith.mulf %28, %cst_12 : f32
      %c0_13 = arith.constant 0 : index
      %c0_14 = arith.constant 0 : index
      %30 = memref.load %arg3[%c0_13, %c0_14] : memref<1x1xf32, #tpu.memory_space<smem>>
      memref.store %29, %arg3[%c0_13, %c0_14] : memref<1x1xf32, #tpu.memory_space<smem>>
    } else {
    }
    return
  }
  func.func @transform_0(%arg0: i32) -> (i32, i32) {
    %c0_i32 = arith.constant 0 : i32
    %c0_i32_0 = arith.constant 0 : i32
    return %arg0, %c0_i32 : i32, i32
  }
  func.func @transform_1(%arg0: i32) -> (i32, i32) {
    %c0_i32 = arith.constant 0 : i32
    %c0_i32_0 = arith.constant 0 : i32
    return %arg0, %c0_i32 : i32, i32
  }
  func.func @transform_2(%arg0: i32) -> (i32, i32) {
    %c0_i32 = arith.constant 0 : i32
    %c0_i32_0 = arith.constant 0 : i32
    %c0_i32_1 = arith.constant 0 : i32
    return %c0_i32, %c0_i32_0 : i32, i32
  }
}

</mosaic_0001>

<bundles_post_ra>
// kernel: tpu_custom_call.1
= control target key start
LH: loop header
LB: loop body
LE: loop exit
PB: predicated region body
PF: predicated region fallthrough
CT: control target
= control target key end

     0   :  { %s122_s0 = inlined_call_operand.vmem [shape: f32[8,40], index: 0, kind: input, shape index: {}]   ;;  %s123_s1 = inlined_call_operand.vmem [shape: s32[8,1], index: 1, kind: input, shape index: {}]   ;;  %s124_s2 = inlined_call_operand.hbm [shape: f32[1,1], index: 2, kind: output, shape index: {}]  }
   0x1   :  { %v19_v0 = vld [vmem:[%s123_s1] sm:$0xff] }
   0x2   :  { %7 = vsyncpa [#allocation4], 0  ;;  %v87_v1 = vmov 0   ;;  %v20_v2 = vlaneseq  ;;  %v18_v4 = vld [vmem:[%s122_s0] sm:$0xff]  ;;  %vm35_vm0 = vcmask 326656   ;;  %s75_s16 = scalar_lea.hbm %s124_s2, 16 }
   0x3   :  { %74 = vset.pattern.permute.xlu0 %v87_v1  ;;  %p76_p0 = scmp.ne.s32.totalorder %s124_s2, %s75_s16  ;;  %p79_p1 = scmp.lt.u32.totalorder %s75_s16, %s124_s2 }
   0x4   :  { %28 = vperm.xlu0 %74, %v19_v0   ;;  %v21_v3 = vand.u32 127, %v20_v2 }
   0x5   :  { %p81_p2 = pnand %p79_p1, %p76_p0 }
  0x83   :  { %v29_v5 = vpop.permute.xlu0 %28 }
  0x84   :  { %vm30_vm1 = vcmp.eq.s32.totalorder %v21_v3, %v29_v5 }
  0x85   :  { %v34_v6 = vsel %vm30_vm1, %v18_v4, 0.0 }
  0x86   :  { %v36_v7 = vsel %vm35_vm0, %v34_v6, 0.0 }
  0x87   :  { %37 = vadd.xlane.f32.xlu0 %v36_v7 }
 0x114   :  { %v38_v8 = vpop.xlane.xlu0 %37 }
 0x115   :  { %v39_v9 = vrot.slane %v38_v8, 4 }
 0x117   :  { %v40_v10 = vadd.f32 %v39_v9, %v38_v8 }
 0x119   :  { %v41_v11 = vrot.slane %v40_v10, 2 }
 0x11b   :  { %v42_v12 = vadd.f32 %v41_v11, %v40_v10 }
 0x11d   :  { %v43_v13 = vrot.slane %v42_v12, 1 }
 0x11f   :  { %v44_v14 = vadd.f32 %v43_v13, %v42_v12 }
 0x121   :  { %70 = vpush %v44_v14 }
 0x152   :  { %s71_s1 = spop %70 }
 0x153   :  { %s53_s13 = ssub.f32 0.0, %s71_s1 }
 0x155   :  { %s54_s14 = smul.f32 0.125, %s53_s13 }
 0x157   :  { %56 = sst [smem:[#allocation3]] %s54_s14 }
 0x158   :  { %84 = shalt.err (!%p81_p2)
}
 0x159   :  { %s88_s21 = smov [#allocation3]  }
 0x15a   :  { %64 = dma.smem_to_hbm %s88_s21, 16, %s124_s2, [#allocation4]  }
 0x15b   :  { %85 = dma.done.wait [#allocation4], 16  }
 0x15c   :  { %86 = vsyncadd [#allocation4], 4294967280 }
 0x15d   :  { %68 = sfence }
 0x15e   :  { %69 = vsyncpa [#allocation4], 1 }

</bundles_post_ra>
